<compile_context>
chip_gen: v5e
topology: v5e:2x2
jax: 0.10.0
libtpu: 0.0.40
codegen_flags: <defaults>
</compile_context>

<pallas_src>
import jax
import jax.numpy as jnp
from jax.experimental import pallas as pl
from jax.experimental.pallas import tpu as pltpu

LANE = 128
SUBLANE_BF16 = 16


def _round_up(n, m):
    return ((n + m - 1) // m) * m


def _pad2d(a, rows, cols):
    return jnp.pad(a, ((0, rows - a.shape[0]), (0, cols - a.shape[1])))


def mlp_kernel(x_ref, w1_ref, b1_ref, w2_ref, b2_ref, w3_ref, b3_ref, o_ref):
    # x_ref: (TB, d_in) f32 -> cast to bf16 for the MXU; wN_ref: bf16; bN_ref: f32 rows;
    # o_ref: (TB, d_out) f32.  Three MXU matmuls with f32 accumulation; bias add / ReLU
    # stay in f32 on the VPU and intermediates are re-cast to bf16 only for the next MXU pass.
    x = x_ref[...].astype(jnp.bfloat16)
    h1 = jnp.dot(x, w1_ref[...], preferred_element_type=jnp.float32) + b1_ref[...]
    h1 = jnp.maximum(h1, 0.0).astype(jnp.bfloat16)
    h2 = jnp.dot(h1, w2_ref[...], preferred_element_type=jnp.float32) + b2_ref[...]
    h2 = jnp.maximum(h2, 0.0).astype(jnp.bfloat16)
    out = jnp.dot(h2, w3_ref[...], preferred_element_type=jnp.float32) + b3_ref[...]
    o_ref[...] = out.astype(o_ref.dtype)


def mlp_forward(x, w1, b1, w2, b2, w3, b3, *, block_b=2048):
    """y = relu(relu(x@w1+b1)@w2+b2)@w3+b3 as a batch-tiled Pallas kernel."""
    B, d_in = x.shape
    d_h1 = w1.shape[1]
    d_h2 = w2.shape[1]
    d_out = w3.shape[1]

    # Hidden dims lane-padded to 128 (numerically exact). HBM-facing feature dims
    # (x's d_in and the output's d_out) are intentionally left unpadded.
    d_h1_p = _round_up(d_h1, LANE)
    d_h2_p = _round_up(d_h2, LANE)

    # Batch tile: big enough to amortize the per-grid-step overhead, small enough that
    # per-tile temps (x, h1/h2 f32+bf16, output) stay a few MiB on every generation.
    tb = min(block_b, _round_up(B, SUBLANE_BF16))
    if B > SUBLANE_BF16 and pl.cdiv(B, tb) < 2:
        # Prefer >=2 grid steps so both v7x TensorCores get a tile (no-op on v5e/v6e).
        tb = max(SUBLANE_BF16, _round_up(pl.cdiv(B, 2), SUBLANE_BF16))
    b_p = _round_up(B, tb)

    x_p = _pad2d(x, b_p, d_in)                            # batch pad only; stays f32
    w1_p = _pad2d(w1, d_in, d_h1_p).astype(jnp.bfloat16)  # (d_in, 128)
    w2_p = _pad2d(w2, d_h1_p, d_h2_p).astype(jnp.bfloat16)
    w3_p = _pad2d(w3, d_h2_p, d_out).astype(jnp.bfloat16)  # (128, d_out) — no output pad
    b1_p = _pad2d(b1, 1, d_h1_p)                           # biases stay f32
    b2_p = _pad2d(b2, 1, d_h2_p)
    b3_p = b3                                              # (1, d_out)

    def resident(shape):
        # Constant block index across the grid -> VMEM-resident; single-buffered so no
        # pointless second buffer / redundant prologue DMA per operand.
        return pl.BlockSpec(shape, lambda i: (0, 0), pipeline_mode=pl.Buffered(1))

    out_p = pl.pallas_call(
        mlp_kernel,
        out_shape=jax.ShapeDtypeStruct((b_p, d_out), jnp.float32),
        grid=(b_p // tb,),
        in_specs=[
            pl.BlockSpec((tb, d_in), lambda i: (i, 0)),    # batch-tiled activations
            resident(w1_p.shape), resident(b1_p.shape),
            resident(w2_p.shape), resident(b2_p.shape),
            resident(w3_p.shape), resident(b3_p.shape),
        ],
        out_specs=pl.BlockSpec((tb, d_out), lambda i: (i, 0)),
        compiler_params=pltpu.CompilerParams(
            dimension_semantics=("parallel",),  # shard batch tiles across TCs (v7x)
        ),
    )(x_p, w1_p, b1_p, w2_p, b2_p, w3_p, b3_p)

    return out_p[:B, :]


def init_linear_params(key, fan_in, fan_out):
    # Deterministic init mimicking PyTorch nn.Linear default (uniform +-1/sqrt(fan_in)).
    kw, kb = jax.random.split(key)
    bound = 1.0 / jnp.sqrt(fan_in)
    w = jax.random.uniform(kw, (fan_in, fan_out), jnp.float32, -bound, bound)
    b = jax.random.uniform(kb, (1, fan_out), jnp.float32, -bound, bound)
    return w, b


def _reference_bf16(x, w1, b1, w2, b2, w3, b3):
    # Same numerics as the kernel: bf16 MXU operands, f32 accumulation/epilogue.
    h = jnp.dot(x.astype(jnp.bfloat16), w1.astype(jnp.bfloat16),
                preferred_element_type=jnp.float32) + b1
    h = jnp.maximum(h, 0.0).astype(jnp.bfloat16)
    h = jnp.dot(h, w2.astype(jnp.bfloat16),
                preferred_element_type=jnp.float32) + b2
    h = jnp.maximum(h, 0.0).astype(jnp.bfloat16)
    return jnp.dot(h, w3.astype(jnp.bfloat16),
                   preferred_element_type=jnp.float32) + b3


def _reference_f32(x, w1, b1, w2, b2, w3, b3):
    h = jnp.maximum(x @ w1 + b1, 0.0)
    h = jnp.maximum(h @ w2 + b2, 0.0)
    return h @ w3 + b3


if __name__ == "__main__":
    batch = 8
    input_dim = 16
    hidden_dim = 64
    output_dim = 1

    key = jax.random.PRNGKey(0)
    kx, k1, k2, k3 = jax.random.split(key, 4)

    x = jax.random.normal(kx, (batch, input_dim), jnp.float32)
    w1, b1 = init_linear_params(k1, input_dim, hidden_dim)
    w2, b2 = init_linear_params(k2, hidden_dim, hidden_dim)
    w3, b3 = init_linear_params(k3, hidden_dim, output_dim)

    # Small batch (single-tile path).
    out = mlp_forward(x, w1, b1, w2, b2, w3, b3)
    out = jax.block_until_ready(out)
    assert out.shape == (batch, output_dim)

    # Strict check vs a reference with identical (bf16-operand, f32-acc) numerics.
    ref = _reference_bf16(x, w1, b1, w2, b2, w3, b3)
    assert jnp.allclose(out, ref, atol=1e-3, rtol=1e-3), "mismatch vs bf16 reference"
    # Loose sanity check vs pure-f32 math (bf16 operand rounding only).
    ref32 = _reference_f32(x, w1, b1, w2, b2, w3, b3)
    assert jnp.allclose(out, ref32, atol=1e-1, rtol=1e-1), "mismatch vs f32 reference"

    # Multi-tile grid paths: (a) default tile -> 2 grid steps via the halving rule,
    # (b) explicit small tile -> 3 grid steps with batch padding.
    big_b = 300
    xb = jax.random.normal(kx, (big_b, input_dim), jnp.float32)
    ref_b = _reference_bf16(xb, w1, b1, w2, b2, w3, b3)

    out_b = mlp_forward(xb, w1, b1, w2, b2, w3, b3)
    out_b = jax.block_until_ready(out_b)
    assert out_b.shape == (big_b, output_dim)
    assert jnp.allclose(out_b, ref_b, atol=1e-3, rtol=1e-3), "mismatch on 2-tile batch"

    out_b2 = mlp_forward(xb, w1, b1, w2, b2, w3, b3, block_b=128)
    out_b2 = jax.block_until_ready(out_b2)
    assert out_b2.shape == (big_b, output_dim)
    assert jnp.allclose(out_b2, ref_b, atol=1e-3, rtol=1e-3), "mismatch on 3-tile batch"

    print("KERNEL_OK")
</pallas_src>

<mosaic_0001>
module attributes {stable_mosaic.version = 11 : i64} {
  func.func @mlp_kernel(%arg0: i32, %arg1: memref<16x16xf32, #tpu.memory_space<vmem>>, %arg2: memref<16x128xbf16, #tpu.memory_space<vmem>>, %arg3: memref<1x128xf32, #tpu.memory_space<vmem>>, %arg4: memref<128x128xbf16, #tpu.memory_space<vmem>>, %arg5: memref<1x128xf32, #tpu.memory_space<vmem>>, %arg6: memref<128x1xbf16, #tpu.memory_space<vmem>>, %arg7: memref<1x1xf32, #tpu.memory_space<vmem>>, %arg8: memref<16x1xf32, #tpu.memory_space<vmem>>) attributes {dimension_semantics = [#tpu.dimension_semantics<parallel>], iteration_bounds = array<i64: 1>, scalar_prefetch = 0 : i64, scratch_operands = 0 : i64, tpu.core_type = #tpu.core_type<tc>, window_params = [{transform_indices = @transform_0, window_bounds = array<i64: 16, 16>}, {pipeline_mode = #tpu.pipeline_mode<synchronous>, transform_indices = @transform_1, window_bounds = array<i64: 16, 128>}, {pipeline_mode = #tpu.pipeline_mode<synchronous>, transform_indices = @transform_2, window_bounds = array<i64: 1, 128>}, {pipeline_mode = #tpu.pipeline_mode<synchronous>, transform_indices = @transform_3, window_bounds = array<i64: 128, 128>}, {pipeline_mode = #tpu.pipeline_mode<synchronous>, transform_indices = @transform_4, window_bounds = array<i64: 1, 128>}, {pipeline_mode = #tpu.pipeline_mode<synchronous>, transform_indices = @transform_5, window_bounds = array<i64: 128, 1>}, {pipeline_mode = #tpu.pipeline_mode<synchronous>, transform_indices = @transform_6, window_bounds = array<i64: 1, 1>}, {transform_indices = @transform_7, window_bounds = array<i64: 16, 1>}]} {
    %c0 = arith.constant 0 : index
    %c0_0 = arith.constant 0 : index
    %0 = vector.load %arg1[%c0, %c0_0] : memref<16x16xf32, #tpu.memory_space<vmem>>, vector<16x16xf32>
    %1 = arith.truncf %0 : vector<16x16xf32> to vector<16x16xbf16>
    %c0_1 = arith.constant 0 : index
    %c0_2 = arith.constant 0 : index
    %2 = vector.load %arg2[%c0_1, %c0_2] : memref<16x128xbf16, #tpu.memory_space<vmem>>, vector<16x128xbf16>
    %cst = arith.constant dense<0.000000e+00> : vector<16x128xf32>
    %3 = tpu.matmul %1, %2, %cst {dimension_numbers = #tpu.dot_dimension_numbers<[1], [0], [0], [1], [0, 0, 1, 1], [], []>} : vector<16x16xbf16>, vector<16x128xbf16>, vector<16x128xf32> -> vector<16x128xf32>
    %c0_3 = arith.constant 0 : index
    %c0_4 = arith.constant 0 : index
    %4 = vector.load %arg3[%c0_3, %c0_4] : memref<1x128xf32, #tpu.memory_space<vmem>>, vector<1x128xf32>
    %5 = vector.broadcast %4 : vector<1x128xf32> to vector<16x128xf32>
    %6 = arith.addf %3, %5 : vector<16x128xf32>
    %cst_5 = arith.constant 0.000000e+00 : f32
    %7 = vector.broadcast %cst_5 : f32 to vector<16x128xf32>
    %8 = arith.maximumf %6, %7 : vector<16x128xf32>
    %9 = arith.truncf %8 : vector<16x128xf32> to vector<16x128xbf16>
    %c0_6 = arith.constant 0 : index
    %c0_7 = arith.constant 0 : index
    %10 = vector.load %arg4[%c0_6, %c0_7] : memref<128x128xbf16, #tpu.memory_space<vmem>>, vector<128x128xbf16>
    %cst_8 = arith.constant dense<0.000000e+00> : vector<16x128xf32>
    %11 = tpu.matmul %9, %10, %cst_8 {dimension_numbers = #tpu.dot_dimension_numbers<[1], [0], [0], [1], [0, 0, 1, 1], [], []>} : vector<16x128xbf16>, vector<128x128xbf16>, vector<16x128xf32> -> vector<16x128xf32>
    %c0_9 = arith.constant 0 : index
    %c0_10 = arith.constant 0 : index
    %12 = vector.load %arg5[%c0_9, %c0_10] : memref<1x128xf32, #tpu.memory_space<vmem>>, vector<1x128xf32>
    %13 = vector.broadcast %12 : vector<1x128xf32> to vector<16x128xf32>
    %14 = arith.addf %11, %13 : vector<16x128xf32>
    %cst_11 = arith.constant 0.000000e+00 : f32
    %15 = vector.broadcast %cst_11 : f32 to vector<16x128xf32>
    %16 = arith.maximumf %14, %15 : vector<16x128xf32>
    %17 = arith.truncf %16 : vector<16x128xf32> to vector<16x128xbf16>
    %c0_12 = arith.constant 0 : index
    %c0_13 = arith.constant 0 : index
    %18 = vector.load %arg6[%c0_12, %c0_13] : memref<128x1xbf16, #tpu.memory_space<vmem>>, vector<128x1xbf16>
    %cst_14 = arith.constant dense<0.000000e+00> : vector<16x1xf32>
    %19 = tpu.matmul %17, %18, %cst_14 {dimension_numbers = #tpu.dot_dimension_numbers<[1], [0], [0], [1], [0, 0, 1, 1], [], []>} : vector<16x128xbf16>, vector<128x1xbf16>, vector<16x1xf32> -> vector<16x1xf32>
    %c0_15 = arith.constant 0 : index
    %c0_16 = arith.constant 0 : index
    %20 = vector.load %arg7[%c0_15, %c0_16] : memref<1x1xf32, #tpu.memory_space<vmem>>, vector<1x1xf32>
    %21 = vector.broadcast %20 : vector<1x1xf32> to vector<16x1xf32>
    %22 = arith.addf %19, %21 : vector<16x1xf32>
    %c0_17 = arith.constant 0 : index
    %c0_18 = arith.constant 0 : index
    %23 = vector.load %arg8[%c0_17, %c0_18] : memref<16x1xf32, #tpu.memory_space<vmem>>, vector<16x1xf32>
    tpu.vector_store %arg8[%c0_17, %c0_18], %22 {strides = array<i32>} : memref<16x1xf32, #tpu.memory_space<vmem>>, vector<16x1xf32>,
    return
  }
  func.func @transform_0(%arg0: i32) -> (i32, i32) {
    %c0_i32 = arith.constant 0 : i32
    %c0_i32_0 = arith.constant 0 : i32
    return %arg0, %c0_i32 : i32, i32
  }
  func.func @transform_1(%arg0: i32) -> (i32, i32) {
    %c0_i32 = arith.constant 0 : i32
    %c0_i32_0 = arith.constant 0 : i32
    %c0_i32_1 = arith.constant 0 : i32
    return %c0_i32, %c0_i32_0 : i32, i32
  }
  func.func @transform_2(%arg0: i32) -> (i32, i32) {
    %c0_i32 = arith.constant 0 : i32
    %c0_i32_0 = arith.constant 0 : i32
    %c0_i32_1 = arith.constant 0 : i32
    return %c0_i32, %c0_i32_0 : i32, i32
  }
  func.func @transform_3(%arg0: i32) -> (i32, i32) {
    %c0_i32 = arith.constant 0 : i32
    %c0_i32_0 = arith.constant 0 : i32
    %c0_i32_1 = arith.constant 0 : i32
    return %c0_i32, %c0_i32_0 : i32, i32
  }
  func.func @transform_4(%arg0: i32) -> (i32, i32) {
    %c0_i32 = arith.constant 0 : i32
    %c0_i32_0 = arith.constant 0 : i32
    %c0_i32_1 = arith.constant 0 : i32
    return %c0_i32, %c0_i32_0 : i32, i32
  }
  func.func @transform_5(%arg0: i32) -> (i32, i32) {
    %c0_i32 = arith.constant 0 : i32
    %c0_i32_0 = arith.constant 0 : i32
    %c0_i32_1 = arith.constant 0 : i32
    return %c0_i32, %c0_i32_0 : i32, i32
  }
  func.func @transform_6(%arg0: i32) -> (i32, i32) {
    %c0_i32 = arith.constant 0 : i32
    %c0_i32_0 = arith.constant 0 : i32
    %c0_i32_1 = arith.constant 0 : i32
    return %c0_i32, %c0_i32_0 : i32, i32
  }
  func.func @transform_7(%arg0: i32) -> (i32, i32) {
    %c0_i32 = arith.constant 0 : i32
    %c0_i32_0 = arith.constant 0 : i32
    return %arg0, %c0_i32 : i32, i32
  }
}

</mosaic_0001>

<bundles_post_ra>
// kernel: tpu_custom_call.1
= control target key start
LH: loop header
LB: loop body
LE: loop exit
PB: predicated region body
PF: predicated region fallthrough
CT: control target
= control target key end

     0   :  { %s535_s0 = inlined_call_operand.hbm [shape: f32[16,16], index: 0, kind: input, shape index: {}]   ;;  %s536_s1 = inlined_call_operand.hbm [shape: bf16[16,128], index: 1, kind: input, shape index: {}]   ;;  %s537_s2 = inlined_call_operand.vmem [shape: f32[1,128], index: 2, kind: input, shape index: {}]   ;;  %s538_s3 = inlined_call_operand.vmem [shape: bf16[128,128], index: 3, kind: input, shape index: {}]   ;;  %s539_s4 = inlined_call_operand.vmem [shape: f32[1,128], index: 4, kind: input, shape index: {}]   ;;  %s540_s5 = inlined_call_operand.vmem [shape: bf16[128,1], index: 5, kind: input, shape index: {}]   ;;  %s541_s6 = inlined_call_operand.<no memory space> [shape: f32[1,1], index: 6, kind: input, shape index: {}]   ;;  %s542_s7 = inlined_call_operand.vmem [shape: f32[16,1], index: 7, kind: output, shape index: {}]  }
   0x1   :  { %v12_v0 = vstv %s541_s6 }
   0x2   :  { %13 = vst [vmem:[#allocation2] sm:$0x1] %v12_v0 }
   0x3   :  { %14 = vsyncpa [#allocation4], 0  ;;  %s20_s28 = sshll.u32 %s535_s0, 4  ;;  %s21_s28 = int_to_ptr.hbm [resolvable:$true] %s20_s28 }
   0x4   :  { %15 = vsyncpa [#allocation6], 0  ;;  %s420_s29 = smov [#allocation3]   ;;  %s33_s10 = sshll.u32 %s536_s1, 4  ;;  %s34_s10 = int_to_ptr.hbm [resolvable:$true] %s33_s10 }
   0x5   :  { %s22_s30 = sshll.u32 %s420_s29, 4  ;;  %s421_s11 = smov 128   ;;  %s23_s30 = int_to_ptr.vmem [resolvable:$true] %s22_s30 }
   0x6   :  { %s422_s12 = smov 8   ;;  %s423_s6 = smov [#allocation5]  }
   0x7   :  { %28 = dma.hbm_to_vmem [thread:$0]  %s21_s28, 256, %s23_s30, [#allocation4], %s421_s11, %s421_s11, %s422_s12  }
   0x8   :  { %s35_s13 = sshll.u32 %s423_s6, 4  ;;  %s424_s14 = smov 64   ;;  %s36_s13 = int_to_ptr.vmem [resolvable:$true] %s35_s13 }
   0x9   :  { %s425_s15 = smov 4  }
   0xa   :  { %41 = dma.hbm_to_vmem [thread:$0]  %s34_s10, 128, %s36_s13, [#allocation6], %s424_s14, %s424_s14, %s425_s15  }
   0xb   :  { %416 = dma.done.wait [#allocation4], 256  }
   0xc   :  { %417 = vsyncadd [#allocation4], 4294967040 }
   0xd   :  { %418 = dma.done.wait [#allocation6], 128  }
   0xe   :  { %419 = vsyncadd [#allocation6], 4294967168  ;;  %v342_v1 = vld [vmem:[#allocation5] sm:$0xff]  ;;  %v61_v2 = vld [vmem:[#allocation3] sm:$0xff]  ;;  %vm76_vm0 = vcmask 130048   ;;  %vm264_vm1 = vcmask 7168  }
   0xf   :  { %v62_v3 = vld [vmem:[#allocation3 + $0x8] sm:$0xff]  ;;  %v350_v5 = vld [vmem:[%s538_s3 + $0x38] sm:$0xff]  ;;  %87 = vmatpush.bf16.msra.mxu0 %v342_v1  ;;  %v347_v8 = vld [vmem:[%s538_s3 + $0x20] sm:$0xff] }
  0x10   :  { %v63_v4 = vpack.c.bf16 %v62_v3, %v61_v2  ;;  %165 = vmatpush.bf16.msra.mxu1 %v350_v5  ;;  %v349_v6 = vld [vmem:[%s538_s3 + $0x30] sm:$0xff]  ;;  %v348_v7 = vld [vmem:[%s538_s3 + $0x28] sm:$0xff]  ;;  %v346_v9 = vld [vmem:[%s538_s3 + $0x18] sm:$0xff] }
  0x11   :  { %v345_v10 = vld [vmem:[%s538_s3 + $0x10] sm:$0xff]  ;;  %v344_v11 = vld [vmem:[%s538_s3 + $0x8] sm:$0xff]  ;;  %v343_v12 = vld [vmem:[%s538_s3] sm:$0xff] }
  0x12   :  { %277 = vmatmul.msk.bf16.vlgmr.msra.gmra.mxu0 %vm76_vm0, %v63_v4  ;;  %v358_v13 = vld [vmem:[%s540_s5 + $0x38] sm:$0xff]  ;;  %v357_v14 = vld [vmem:[%s540_s5 + $0x30] sm:$0xff]  ;;  %v356_v15 = vld [vmem:[%s540_s5 + $0x28] sm:$0xff] }
  0x13   :  { %250 = vmatpush.bf16.msra.mxu2 %v358_v13  ;;  %v355_v16 = vld [vmem:[%s540_s5 + $0x20] sm:$0xff]  ;;  %v354_v25 = vld [vmem:[%s540_s5 + $0x18] sm:$0xff]  ;;  %v353_v26 = vld [vmem:[%s540_s5 + $0x10] sm:$0xff] }
  0x14   :  { %166 = vmatpush.bf16.msra.mxu1 %v349_v6  ;;  %v365_v18 = vld [vmem:[%s537_s2] ss:$0 sm:$0xff]  ;;  %v352_v27 = vld [vmem:[%s540_s5 + $0x8] sm:$0xff] }
  0x15   :  { %v351_v28 = vld [vmem:[%s540_s5] sm:$0xff] }
  0x16   :  { %v366_v30 = vld [vmem:[%s539_s4] ss:$0 sm:$0xff] }
  0x17   :  { %251 = vmatpush.bf16.msra.mxu2 %v357_v14  ;;  %v367_v37 = vld [vmem:[#allocation2] ss:$0 sm:$0xff] }
  0x18   :  { %167 = vmatpush.bf16.msra.mxu1 %v348_v7 }
  0x1b   :  { %252 = vmatpush.bf16.msra.mxu2 %v356_v15 }
  0x1c   :  { %168 = vmatpush.bf16.msra.mxu1 %v347_v8 }
  0x1f   :  { %253 = vmatpush.bf16.msra.mxu2 %v355_v16 }
  0x20   :  { %169 = vmatpush.bf16.msra.mxu1 %v346_v9 }
  0x23   :  { %254 = vmatpush.bf16.msra.mxu2 %v354_v25 }
  0x24   :  { %170 = vmatpush.bf16.msra.mxu1 %v345_v10 }
  0x27   :  { %255 = vmatpush.bf16.msra.mxu2 %v353_v26 }
  0x28   :  { %171 = vmatpush.bf16.msra.mxu1 %v344_v11 }
  0x2b   :  { %256 = vmatpush.bf16.msra.mxu2 %v352_v27 }
  0x2c   :  { %172 = vmatpush.bf16.msra.mxu1 %v343_v12 }
  0x2f   :  { %257 = vmatpush.bf16.msra.mxu2 %v351_v28 }
  0x8f   :  { %v89_v17 = vpop.f32.mrf.mxu0 }
  0x90   :  { %v90_v19 = vadd.f32 %v365_v18, %v89_v17 }
  0x92   :  { %v94_v22 = vmax.f32 %v90_v19, 0.0 }
  0x97   :  { %v91_v20 = vpop.f32.mrf.mxu0 }
  0x98   :  { %v92_v21 = vadd.f32 %v365_v18, %v91_v20 }
  0x9a   :  { %v95_v23 = vmax.f32 %v92_v21, 0.0 }
  0x9c   :  { %v96_v24 = vpack.c.bf16 %v95_v23, %v94_v22 }
  0x9e   :  { %173 = vmatmul.bf16.vlgmr.msra.gmra.mxu1 %v96_v24 }
 0x11b   :  { %v174_v29 = vpop.f32.mrf.mxu1 }
 0x11c   :  { %v175_v31 = vadd.f32 %v366_v30, %v174_v29 }
 0x11e   :  { %v179_v34 = vmax.f32 %v175_v31, 0.0 }
 0x123   :  { %v176_v32 = vpop.f32.mrf.mxu1 }
 0x124   :  { %v177_v33 = vadd.f32 %v366_v30, %v176_v32 }
 0x126   :  { %v180_v35 = vmax.f32 %v177_v33, 0.0 }
 0x128   :  { %v181_v36 = vpack.c.bf16 %v180_v35, %v179_v34 }
 0x12a   :  { %258 = vmatmul.bf16.vlgmr.msra.gmra.mxu2 %v181_v36 }
 0x1ad   :  { %v259_v38 = vpop.f32.mrf.mxu2 }
 0x1ae   :  { %v260_v39 = vadd.f32 %v367_v37, %v259_v38 }
 0x1b0   :  { %265 = vst.msk [vmem:[%s542_s7] sm:$0xff] %vm264_vm1, %v260_v39 }
 0x1b5   :  { %v261_v40 = vpop.f32.mrf.mxu2 }
 0x1b6   :  { %v262_v41 = vadd.f32 %v367_v37, %v261_v40 }
 0x1b8   :  { %266 = vst.msk [vmem:[%s542_s7 + $0x8] sm:$0xff] %vm264_vm1, %v262_v41 }
 0x1b9   :  { %271 = vsyncpa [#allocation4], 1 }
 0x1ba   :  { %272 = vsyncpa [#allocation6], 1 }

</bundles_post_ra>
